<compile_context>
chip_gen: v5e
topology: v5e:2x2
jax: 0.10.0
libtpu: 0.0.40
codegen_flags: <defaults>
</compile_context>

<pallas_src>
import functools

import jax
import jax.numpy as jnp
from jax.experimental import pallas as pl
from jax.experimental.pallas import tpu as pltpu


def se_kernel(x_ref, w1t_ref, b1_ref, w2t_ref, b2_ref, o_ref, *, inv_hw):
    # x_ref / o_ref: (TB, C, HWp) tile. HW padding (if any) is zeros, so the
    # spatial sum is exact; we divide by the true HW via inv_hw.
    # --- squeeze: global average pool over the spatial (lane) axis, f32 acc.
    y = jnp.sum(x_ref[...].astype(jnp.float32), axis=-1) * inv_hw     # (TB, C)

    # --- excitation: Linear(C -> C_r) + ReLU (weights pre-transposed).
    h = jnp.dot(y, w1t_ref[...], preferred_element_type=jnp.float32) + b1_ref[...]
    h = jnp.maximum(h, 0.0)                                           # (TB, C_r)

    # --- Linear(C_r -> C) + Sigmoid (keep FC path in f32).
    z = jnp.dot(h, w2t_ref[...], preferred_element_type=jnp.float32) + b2_ref[...]
    s = 1.0 / (1.0 + jnp.exp(-z))                                     # (TB, C)

    # --- scale: re-read x in its native dtype, broadcast s over HW.
    scale = s[:, :, None].astype(x_ref.dtype)
    o_ref[...] = (x_ref[...] * scale).astype(o_ref.dtype)


def _pick_tb(B, C, HWp, itemsize, tile_budget_bytes=24 << 20):
    """Largest batch tile that fits the VMEM budget, keeps >= 2 grid steps
    when B allows it (v7x has 2 TensorCores), and divides B evenly."""
    # double-buffered input + output tiles plus a transient f32 squeeze temp
    per_elem = C * HWp * (4 * itemsize + 4)
    tb = int(max(1, min(B, tile_budget_bytes // per_elem)))
    tb = min(tb, max(1, pl.cdiv(B, 2)))      # leave >= 2 steps for megacore
    while B % tb:
        tb -= 1
    return tb


def se_layer(x_nchw, w1, b1, w2, b2):
    """SELayer forward. x_nchw: (B, C, H, W). Weights use torch.nn.Linear
    convention: w1 (C_r, C), b1 (C_r,), w2 (C, C_r), b2 (C,)."""
    B, C, H, W = x_nchw.shape
    C_r = w1.shape[0]
    HW = H * W

    x = x_nchw.reshape(B, C, HW)
    # Lane-dense stores: pad HW (lane axis) to a multiple of 128 when needed.
    HWp = HW if HW % 128 == 0 else (HW // 128 + 1) * 128
    if HWp != HW:
        x = jnp.pad(x, ((0, 0), (0, 0), (0, HWp - HW)))

    itemsize = jnp.dtype(x_nchw.dtype).itemsize
    TB = _pick_tb(B, C, HWp, itemsize)
    grid = (B // TB,)

    # Pre-transpose weights so the kernel issues no XLU transposes.
    w1t = jnp.asarray(w1).T              # (C, C_r)
    w2t = jnp.asarray(w2).T              # (C_r, C)
    b1_2d = b1.reshape(1, C_r)
    b2_2d = b2.reshape(1, C)

    w_bytes = (w1t.size + w2t.size + b1_2d.size + b2_2d.size) * jnp.dtype(w1.dtype).itemsize
    cost = pl.CostEstimate(
        flops=4 * B * C * C_r + B * C * HWp,        # two tiny FCs + scale mul
        transcendentals=B * C,                       # sigmoid exp
        bytes_accessed=2 * B * C * HWp * itemsize + w_bytes,
    )

    out = pl.pallas_call(
        functools.partial(se_kernel, inv_hw=1.0 / HW),
        out_shape=jax.ShapeDtypeStruct((B, C, HWp), x_nchw.dtype),
        grid_spec=pltpu.PrefetchScalarGridSpec(
            num_scalar_prefetch=0,
            grid=grid,
            in_specs=[
                pl.BlockSpec((TB, C, HWp), lambda b: (b, 0, 0)),   # x tile
                pl.BlockSpec((C, C_r), lambda b: (0, 0)),          # w1.T (resident)
                pl.BlockSpec((1, C_r), lambda b: (0, 0)),          # b1
                pl.BlockSpec((C_r, C), lambda b: (0, 0)),          # w2.T (resident)
                pl.BlockSpec((1, C), lambda b: (0, 0)),            # b2
            ],
            out_specs=pl.BlockSpec((TB, C, HWp), lambda b: (b, 0, 0)),
        ),
        compiler_params=pltpu.CompilerParams(
            dimension_semantics=("parallel",),
            vmem_limit_bytes=48 * 1024 * 1024,   # > v5e 16 MiB default, < v7x 64 MiB physical
        ),
        cost_estimate=cost,
    )(x, w1t, b1_2d, w2t, b2_2d)

    if HWp != HW:
        out = out[:, :, :HW]
    return out.reshape(B, C, H, W)


def se_layer_ref(x, w1, b1, w2, b2):
    """Pure-JAX reference mirroring the PyTorch forward."""
    y = jnp.mean(x, axis=(2, 3))                               # (B, C)
    h = jnp.maximum(y @ w1.T + b1, 0.0)                        # (B, C_r)
    s = jax.nn.sigmoid(h @ w2.T + b2)                          # (B, C)
    return x * s[:, :, None, None]


if __name__ == "__main__":
    B, C, H, W = 2, 16, 16, 16
    reduction = 8
    C_r = C // reduction

    key = jax.random.PRNGKey(0)
    kx, k1, k2, k3, k4 = jax.random.split(key, 5)

    x = jax.random.normal(kx, (B, C, H, W), dtype=jnp.float32)
    # deterministic synthetic parameters (torch.nn.Linear shapes)
    w1 = jax.random.normal(k1, (C_r, C), dtype=jnp.float32) * 0.1
    b1 = jax.random.normal(k2, (C_r,), dtype=jnp.float32) * 0.1
    w2 = jax.random.normal(k3, (C, C_r), dtype=jnp.float32) * 0.1
    b2 = jax.random.normal(k4, (C,), dtype=jnp.float32) * 0.1

    out = jax.block_until_ready(se_layer(x, w1, b1, w2, b2))

    ref = se_layer_ref(x, w1, b1, w2, b2)
    assert out.shape == (B, C, H, W)
    assert jnp.allclose(out, ref, atol=1e-5, rtol=1e-5), "mismatch vs reference"

    print("KERNEL_OK")
</pallas_src>

<mosaic_0001>
module attributes {stable_mosaic.version = 11 : i64} {
  func.func @se_kernel(%arg0: i32, %arg1: memref<1x16x256xf32, #tpu.memory_space<vmem>>, %arg2: memref<16x2xf32, #tpu.memory_space<vmem>>, %arg3: memref<1x2xf32, #tpu.memory_space<vmem>>, %arg4: memref<2x16xf32, #tpu.memory_space<vmem>>, %arg5: memref<1x16xf32, #tpu.memory_space<vmem>>, %arg6: memref<1x16x256xf32, #tpu.memory_space<vmem>>) attributes {dimension_semantics = [#tpu.dimension_semantics<parallel>], iteration_bounds = array<i64: 2>, scalar_prefetch = 0 : i64, scratch_operands = 0 : i64, tpu.core_type = #tpu.core_type<tc>, window_params = [{transform_indices = @transform_0, window_bounds = array<i64: 1, 16, 256>}, {pipeline_mode = #tpu.pipeline_mode<synchronous>, transform_indices = @transform_1, window_bounds = array<i64: 16, 2>}, {pipeline_mode = #tpu.pipeline_mode<synchronous>, transform_indices = @transform_2, window_bounds = array<i64: 1, 2>}, {pipeline_mode = #tpu.pipeline_mode<synchronous>, transform_indices = @transform_3, window_bounds = array<i64: 2, 16>}, {pipeline_mode = #tpu.pipeline_mode<synchronous>, transform_indices = @transform_4, window_bounds = array<i64: 1, 16>}, {transform_indices = @transform_5, window_bounds = array<i64: 1, 16, 256>}]} {
    %c0 = arith.constant 0 : index
    %c0_0 = arith.constant 0 : index
    %c0_1 = arith.constant 0 : index
    %0 = vector.load %arg1[%c0, %c0_0, %c0_1] : memref<1x16x256xf32, #tpu.memory_space<vmem>>, vector<1x16x256xf32>
    %cst = arith.constant dense<0.000000e+00> : vector<1x16xf32>
    %1 = vector.multi_reduction <add>, %0, %cst [2] : vector<1x16x256xf32> to vector<1x16xf32>
    %cst_2 = arith.constant 3.906250e-03 : f32
    %2 = vector.broadcast %cst_2 : f32 to vector<1x16xf32>
    %3 = arith.mulf %1, %2 : vector<1x16xf32>
    %c0_3 = arith.constant 0 : index
    %c0_4 = arith.constant 0 : index
    %4 = vector.load %arg2[%c0_3, %c0_4] : memref<16x2xf32, #tpu.memory_space<vmem>>, vector<16x2xf32>
    %cst_5 = arith.constant dense<0.000000e+00> : vector<1x2xf32>
    %5 = tpu.matmul %3, %4, %cst_5 {dimension_numbers = #tpu.dot_dimension_numbers<[1], [0], [0], [1], [0, 0, 1, 1], [], []>} : vector<1x16xf32>, vector<16x2xf32>, vector<1x2xf32> -> vector<1x2xf32>
    %c0_6 = arith.constant 0 : index
    %c0_7 = arith.constant 0 : index
    %6 = vector.load %arg3[%c0_6, %c0_7] : memref<1x2xf32, #tpu.memory_space<vmem>>, vector<1x2xf32>
    %7 = arith.addf %5, %6 : vector<1x2xf32>
    %cst_8 = arith.constant 0.000000e+00 : f32
    %8 = vector.broadcast %cst_8 : f32 to vector<1x2xf32>
    %9 = arith.maximumf %7, %8 : vector<1x2xf32>
    %c0_9 = arith.constant 0 : index
    %c0_10 = arith.constant 0 : index
    %10 = vector.load %arg4[%c0_9, %c0_10] : memref<2x16xf32, #tpu.memory_space<vmem>>, vector<2x16xf32>
    %cst_11 = arith.constant dense<0.000000e+00> : vector<1x16xf32>
    %11 = tpu.matmul %9, %10, %cst_11 {dimension_numbers = #tpu.dot_dimension_numbers<[1], [0], [0], [1], [0, 0, 1, 1], [], []>} : vector<1x2xf32>, vector<2x16xf32>, vector<1x16xf32> -> vector<1x16xf32>
    %c0_12 = arith.constant 0 : index
    %c0_13 = arith.constant 0 : index
    %12 = vector.load %arg5[%c0_12, %c0_13] : memref<1x16xf32, #tpu.memory_space<vmem>>, vector<1x16xf32>
    %13 = arith.addf %11, %12 : vector<1x16xf32>
    %cst_14 = arith.constant 0.000000e+00 : f32
    %14 = vector.broadcast %cst_14 : f32 to vector<1x16xf32>
    %15 = arith.subf %14, %13 : vector<1x16xf32>
    %16 = math.exp %15 : vector<1x16xf32>
    %cst_15 = arith.constant 1.000000e+00 : f32
    %17 = vector.broadcast %cst_15 : f32 to vector<1x16xf32>
    %18 = arith.addf %17, %16 : vector<1x16xf32>
    %cst_16 = arith.constant 1.000000e+00 : f32
    %19 = vector.broadcast %cst_16 : f32 to vector<1x16xf32>
    %20 = arith.divf %19, %18 : vector<1x16xf32>
    %21 = vector.shape_cast %20 : vector<1x16xf32> to vector<1x16x1xf32>
    %c0_17 = arith.constant 0 : index
    %c0_18 = arith.constant 0 : index
    %c0_19 = arith.constant 0 : index
    %22 = vector.load %arg1[%c0_17, %c0_18, %c0_19] : memref<1x16x256xf32, #tpu.memory_space<vmem>>, vector<1x16x256xf32>
    %23 = vector.broadcast %21 : vector<1x16x1xf32> to vector<1x16x256xf32>
    %24 = arith.mulf %22, %23 : vector<1x16x256xf32>
    %c0_20 = arith.constant 0 : index
    %c0_21 = arith.constant 0 : index
    %c0_22 = arith.constant 0 : index
    %25 = vector.load %arg6[%c0_20, %c0_21, %c0_22] : memref<1x16x256xf32, #tpu.memory_space<vmem>>, vector<1x16x256xf32>
    tpu.vector_store %arg6[%c0_20, %c0_21, %c0_22], %24 {strides = array<i32>} : memref<1x16x256xf32, #tpu.memory_space<vmem>>, vector<1x16x256xf32>,
    return
  }
  func.func @transform_0(%arg0: i32) -> (i32, i32, i32) {
    %c0_i32 = arith.constant 0 : i32
    %c0_i32_0 = arith.constant 0 : i32
    %c0_i32_1 = arith.constant 0 : i32
    return %arg0, %c0_i32, %c0_i32_0 : i32, i32, i32
  }
  func.func @transform_1(%arg0: i32) -> (i32, i32) {
    %c0_i32 = arith.constant 0 : i32
    %c0_i32_0 = arith.constant 0 : i32
    %c0_i32_1 = arith.constant 0 : i32
    return %c0_i32, %c0_i32_0 : i32, i32
  }
  func.func @transform_2(%arg0: i32) -> (i32, i32) {
    %c0_i32 = arith.constant 0 : i32
    %c0_i32_0 = arith.constant 0 : i32
    %c0_i32_1 = arith.constant 0 : i32
    return %c0_i32, %c0_i32_0 : i32, i32
  }
  func.func @transform_3(%arg0: i32) -> (i32, i32) {
    %c0_i32 = arith.constant 0 : i32
    %c0_i32_0 = arith.constant 0 : i32
    %c0_i32_1 = arith.constant 0 : i32
    return %c0_i32, %c0_i32_0 : i32, i32
  }
  func.func @transform_4(%arg0: i32) -> (i32, i32) {
    %c0_i32 = arith.constant 0 : i32
    %c0_i32_0 = arith.constant 0 : i32
    %c0_i32_1 = arith.constant 0 : i32
    return %c0_i32, %c0_i32_0 : i32, i32
  }
  func.func @transform_5(%arg0: i32) -> (i32, i32, i32) {
    %c0_i32 = arith.constant 0 : i32
    %c0_i32_0 = arith.constant 0 : i32
    %c0_i32_1 = arith.constant 0 : i32
    return %arg0, %c0_i32, %c0_i32_0 : i32, i32, i32
  }
}

</mosaic_0001>

<bundles_post_ra>
// kernel: tpu_custom_call.1
= control target key start
LH: loop header
LB: loop body
LE: loop exit
PB: predicated region body
PF: predicated region fallthrough
CT: control target
= control target key end

     0   :  { %10 = vsyncpa [#allocation3], 0  ;;  %s822_s0 = inlined_call_operand.hbm [shape: f32[2,16,256], index: 0, kind: input, shape index: {}]   ;;  %s823_s1 = inlined_call_operand.vmem [shape: f32[16,2], index: 1, kind: input, shape index: {}]   ;;  %s824_s2 = inlined_call_operand.vmem [shape: f32[1,2], index: 2, kind: input, shape index: {}]   ;;  %s825_s3 = inlined_call_operand.vmem [shape: f32[2,16], index: 3, kind: input, shape index: {}]   ;;  %s826_s4 = inlined_call_operand.vmem [shape: f32[1,16], index: 4, kind: input, shape index: {}]   ;;  %s827_s5 = inlined_call_operand.hbm [shape: f32[2,16,256], index: 5, kind: output, shape index: {}]  }
   0x1   :  { %12 = vsyncpa [#allocation3 + $0x1], 0 }
   0x2   :  { %13 = vsyncpa [#allocation4], 0 }
   0x3   :  { %15 = vsyncpa [#allocation4 + $0x1], 0  ;;  %s660_s18 = smov 0   ;;  %s662_s19 = smov 0  }
   0x4   :  { %s664_s20 = smov 0   ;;  %s666_s21 = smov 0  }
   0x5 LB: > { %s681_s22 = sadd.s32 4294967295, %s624_s21   ;;  %s452_s23 = sadd.s32 4294967294, %s624_s21   ;;  %s624_s21 = sphi %s666_s21, %s837_s21   ;;  %s620_s20 = sphi %s664_s20, %s836_s20   ;;  %s616_s19 = sphi %s662_s19, %s835_s19   ;;  %s612_s18 = sphi %s660_s18, %s834_s18  }
   0x6   : > { %s685_s24 = sadd.s32 1, %s624_s21   ;;  %s28_s25 = sadd.s32 1, %s620_s20 }
   0x7   : > { %s25_s26 = ssub.s32 %s624_s21, %s685_s24  ;;  %p35_p0 = scmp.ne.s32.totalorder %s620_s20, %s616_s19 }
   0x8   : > { %p26_p1 = scmp.eq.s32.totalorder %s25_s26, 0  ;;  %p36_p2 = scmp.eq.s32.totalorder %s624_s21, 0 }
   0x9   : > { %p41_p3 = scmp.ne.s32.totalorder %s616_s19, %s612_s18  ;;  %p42_p4 = scmp.eq.s32.totalorder %s681_s22, 0 }
   0xa   : > { %s697_s27 = scalar_select %p26_p1, %s620_s20, %s28_s25  }
   0xb   : > { %p699_p5 = por %p36_p2, %p35_p0  ;;  %p703_p6 = por %p42_p4, %p41_p3 }
   0xc   : > { %p149_p7 = scmp.eq.s32.totalorder %s681_s22, 1  ;;  %p155_p8 = scmp.eq.s32.totalorder %s452_s23, 1 }
   0xd   : > { %p483_p10 = scmp.lt.s32.totalorder %s624_s21, 2  ;;  %s187_s7 = sand.u32 1, %s620_s20  }
   0xe   : > { %p710_p11 = por %p149_p7, %p35_p0  ;;  %p714_p12 = por %p155_p8, %p41_p3 }
   0xf   : > { %s469_s8 = sshll.u32 %s624_s21, 5  ;;  %s455_s9 = sshll.u32 %s187_s7, 5 }
  0x10   : > { %s196_s12 = scalar_lea.hbm %s822_s0, %s469_s8  ;;  %s191_s14 = scalar_lea.vmem [#allocation2], %s455_s9 }
  0x11   : > { %s197_s13 = sshll.u32 %s196_s12, 4  ;;  %s199_s15 = sshll.u32 %s191_s14, 4  ;;  %s198_s13 = int_to_ptr.hbm [resolvable:$true] %s197_s13  ;;  %s200_s15 = int_to_ptr.vmem [resolvable:$true] %s199_s15 }
  0x12   : > { %p725_p13 = pnand %p483_p10, %p699_p5  ;;  %p458_p0 = scmp.ge.s32.totalorder %s624_s21, 1 }
  0x13   : > { %p207_p1 = scmp.lt.s32.totalorder %s624_s21, 3  ;;  %s188_s17 = scalar_lea.sflag [#allocation3], %s187_s7 }
  0x14   : > { %s528_s23 = sshra.s32 %s198_s13, 4  ;;  %p532_p3 = pneg %p725_p13  ;;  %s529_s23 = int_to_ptr.hbm [resolvable:$true] %s528_s23 }
  0x15   : > { %s530_s25 = scalar_lea.hbm %s529_s23, 32  ;;  %s535_s28 = scalar_lea.hbm %s822_s0, 64 }
  0x16   : > { %p531_p2 = scmp.ne.s32.totalorder %s529_s23, %s530_s25  ;;  %p536_p5 = scmp.lt.s32.totalorder %s529_s23, %s822_s0 }
  0x17   : > { %p537_p8 = scmp.lt.s32.totalorder %s535_s28, %s530_s25 }
  0x18   : > { %p533_p4 = pnand %p532_p3, %p531_p2 }
  0x19   : > { %p538_p10 = por %p537_p8, %p536_p5 }
  0x1a   : > { %p534_p7 = pneg %p533_p4 }
  0x1c   : > { %p539_p9 = pnand %p538_p10, %p534_p7 }
  0x1e   : > { %542 = shalt.err (!%p539_p9)
}
  0x1f   : > { %s626_s7 = smov 256   ;;  %s627_s11 = smov 16  }
  0x20   : > { %478 = dma.hbm_to_vmem [thread:$0]  (!%p725_p13), %s198_s13, 512, %s200_s15, %s188_s17, %s626_s7, %s626_s7, %s627_s11  }
  0x21   : > { %p208_p2 = pnand %p458_p0, %p207_p1 }
  0x22   : > { %s746_s12 = sand.u32 (!%p208_p2), 1, %s616_s19  }
  0x23   : > { %211 = sbr.rel (%p208_p2) target bundleno = 601 (0x259), region = 40  ;;  %s459_s14 = sshll.u32 (!%p208_p2), %s746_s12, 5 }
  0x24   : > { %s214_s23 = scalar_lea.sflag (!%p208_p2), [#allocation3], %s746_s12  ;;  %s217_s25 = scalar_lea.vmem (!%p208_p2), [#allocation2], %s459_s14 }
  0x28   : > { %603 = dma.done.wait (%p703_p6), %s214_s23, 512  }
  0x29   : > { %605 = vsyncadd (%p703_p6), %s214_s23, 4294966784  ;;  %v756_v0 = vld [vmem:[%s217_s25] sm:$0xff]  ;;  %v758_v1 = vld [vmem:[%s217_s25 + $0x8] sm:$0xff]  ;;  %v262_v9 = vlaneseq  ;;  %vm267_vm0 = vcmask 130112   ;;  %vm269_vm1 = vcmask 130048   ;;  %vm299_vm2 = vcmask 1041408  }
  0x2a   : > { %v249_v2 = vadd.f32 %v758_v1, %v756_v0  ;;  %v762_v3 = vld [vmem:[%s217_s25 + $0x10] sm:$0xff]  ;;  %v764_v4 = vld [vmem:[%s217_s25 + $0x18] sm:$0xff]  ;;  %v258_v6 = vld [vmem:[%s823_s1 + $0x8] sm:$0xff]  ;;  %vm295_vm3 = vcmask 15360   ;;  %s244_s7 = scalar_lea.vmem [#allocation5], %s459_s14  ;;  %s470_s11 = sshll.u32 %s681_s22, 5 }
  0x2b   : > { %v252_v5 = vadd.f32 %v764_v4, %v762_v3  ;;  %286 = vmatpush.msra.mxu0 %v258_v6  ;;  %v257_v7 = vld [vmem:[%s823_s1] sm:$0xff]  ;;  %v263_v10 = vand.u32 127, %v262_v9  ;;  %v344_v23 = vshrl.u32 %v262_v9, 7  ;;  %s375_s13 = scalar_lea.hbm %s827_s5, %s470_s11  ;;  %s376_s15 = sshll.u32 %s244_s7, 4  ;;  %s377_s15 = int_to_ptr.vmem [resolvable:$true] %s376_s15 }
  0x2c   : > { %250 = vadd.xlane.f32.xlu0 %v249_v2  ;;  %v293_v18 = vld [vmem:[%s825_s3] sm:$0x3]  ;;  %s378_s29 = sshll.u32 %s375_s13, 4  ;;  %s364_s14 = scalar_lea.sflag [#allocation4], %s746_s12  ;;  %s379_s29 = int_to_ptr.hbm [resolvable:$true] %s378_s29 }
  0x2d   : > { %287 = vmatpush.msra.mxu0 %v257_v7  ;;  %v265_v12 = vadd.s32 4294967288, %v263_v10  ;;  %462 = vmatpush.msk.msra.mxu1 %vm299_vm2, %v293_v18  ;;  %v259_v19 = vld [vmem:[%s824_s2] sm:$0x1]  ;;  %v351_v24 = vadd.s32 8, %v344_v23  ;;  %s572_s16 = sshra.s32 %s379_s29, 4  ;;  %s578_s8 = scalar_lea.hbm %s827_s5, 64  ;;  %s573_s16 = int_to_ptr.hbm [resolvable:$true] %s572_s16 }
  0x2e   : > { %521 = vset.pattern.permute.xlu1 %v344_v23  ;;  %v294_v25 = vld [vmem:[%s826_s4] sm:$0x1]  ;;  %s574_s22 = scalar_lea.hbm %s573_s16, 32  ;;  %p579_p0 = scmp.lt.s32.totalorder %s573_s16, %s827_s5 }
  0x2f   : > { %523 = vset.pattern.permute.xlu0 %v351_v24  ;;  %p575_p6 = scmp.ne.s32.totalorder %s573_s16, %s574_s22  ;;  %p580_p1 = scmp.lt.s32.totalorder %s578_s8, %s574_s22 }
  0x31   : > { %p576_p9 = pnand %p575_p6, %p710_p11  ;;  %p581_p3 = por %p580_p1, %p579_p0 }
  0x33   : > { %p577_p13 = pneg %p576_p9 }
  0x34   : > { %253 = vadd.xlane.f32.xlu0 %v252_v5 }
  0x35   : > { %p582_p4 = pnand %p581_p3, %p577_p13 }
  0x9f   : > { %v251_v8 = vpop.xlane.xlu0 %250 }
  0xa0   : > { %v255_v11 = vmul.f32 0.00390625, %v251_v8 }
  0xa2   : > { %v264_v15 = vperm.slane %v255_v11, %v263_v10 }
  0xa7   : > { %v254_v13 = vpop.xlane.xlu0 %253 }
  0xa8   : > { %v256_v14 = vmul.f32 0.00390625, %v254_v13 }
  0xaa   : > { %v266_v16 = vperm.slane %v256_v14, %v265_v12 }
  0xac   : > { %v268_v17 = vsel %vm267_vm0, %v266_v16, %v264_v15 }
  0xad   : > { %461 = vmatmul.msk.f32.vlgmr.msra.gmra.mxu0 %vm269_vm1, %v268_v17 }
 0x12a   : > { %v289_v20 = vpop.f32.mrf.mxu0 }
 0x12b   : > { %v290_v21 = vadd.f32 %v289_v20, %v259_v19 }
 0x12d   : > { %v292_v22 = vmax.f32 %v290_v21, 0.0 }
 0x12f   : > { %463 = vmatmul.msk.f32.vlgmr.msra.gmra.mxu1 %vm295_vm3, %v292_v22 }
 0x1ac   : > { %v320_v26 = vpop.f32.mrf.mxu1 }
 0x1ad   : > { %v321_v27 = vadd.f32 %v320_v26, %v294_v25 }
 0x1af   : > { %v323_v28 = vsub.f32 0.0, %v321_v27 }
 0x1b1   : > { %v324_v29 = vmul.f32 1.442695, %v323_v28 }
 0x1b3   : > { %524 = vpow2.f32 %v324_v29 }
 0x1b9   : > { %v525_v30 = vpop.eup %524 }
 0x1ba   : > { %v326_v31 = vadd.f32 1.0, %v525_v30 }
 0x1bc   : > { %526 = vrcp.f32 %v326_v31  ;;  %v338_v35 = vand.u32 2147483648, %v326_v31  ;;  %v336_v37 = vand.u32 2147483647, %v326_v31  ;;  %vm332_vm5 = vweird.f32 %v326_v31 }
 0x1be   : > { %v339_v39 = vor.u32 1.1754944e-38, %v338_v35  ;;  %vm337_vm7 = vcmp.eq.f32.partialorder %v336_v37, 8.507059e+37 }
 0x1c2   : > { %v527_v32 = vpop.eup %526 }
 0x1c3   : > { %v328_v33 = vmul.f32 %v527_v32, %v326_v31  ;;  %vm333_vm4 = vweird.f32 %v527_v32 }
 0x1c4   : > { %vm334_vm6 = vmor %vm332_vm5, %vm333_vm4 }
 0x1c5   : > { %v329_v34 = vsub.f32 1.0, %v328_v33 }
 0x1c7   : > { %v330_v36 = vmul.f32 %v527_v32, %v329_v34 }
 0x1c9   : > { %v331_v38 = vadd.f32 %v527_v32, %v330_v36 }
 0x1cb   : > { %v335_v40 = vsel %vm334_vm6, %v527_v32, %v331_v38 }
 0x1cc   : > { %v340_v41 = vsel %vm337_vm7, %v339_v39, %v335_v40 }
 0x1cd   : > { %v342_v42 = vperm.slane %v340_v41, 0 }
 0x1cf   : > { %347 = vperm.xlu1 %521, %v342_v42  }
 0x1d7   : > { %522 = vset.pattern.permute.xlu1 %v351_v24 }
 0x1df   : > { %353 = vperm.xlu1 %522, %v342_v42  }
 0x241   : > { %v348_v43 = vpop.permute.xlu1 %347 }
 0x242   : > { %v355_v44 = vmul.f32 %v348_v43, %v756_v0  ;;  %v356_v45 = vmul.f32 %v348_v43, %v758_v1 }
 0x244   : > { %359 = vst [vmem:[%s244_s7] sm:$0xff] %v355_v44 }
 0x245   : > { %360 = vst [vmem:[%s244_s7 + $0x8] sm:$0xff] %v356_v45 }
 0x251   : > { %v354_v46 = vpop.permute.xlu1 %353 }
 0x252   : > { %v357_v47 = vmul.f32 %v354_v46, %v762_v3  ;;  %v358_v48 = vmul.f32 %v354_v46, %v764_v4 }
 0x254   : > { %361 = vst [vmem:[%s244_s7 + $0x10] sm:$0xff] %v357_v47 }
 0x255   : > { %362 = vst [vmem:[%s244_s7 + $0x18] sm:$0xff] %v358_v48 }
 0x256   : > { %585 = shalt.err (!%p582_p4)
}
 0x257   : > { %s628_s12 = smov 256   ;;  %s629_s10 = smov 16  }
 0x258   : > { %473 = dma.vmem_to_hbm [thread:$0]  (%p710_p11), %s377_s15, 512, %s379_s29, %s364_s14, %s628_s12, %s628_s12, %s629_s10  }
 0x259 PF: > { %s393_s7 = sand.u32 1, %s612_s18   ;;  %p833_p7 = scmp.ge.s32.totalorder %s624_s21, 2 }
 0x25a   : > { %s394_s11 = scalar_lea.sflag [#allocation4], %s393_s7 }
 0x25b   : > { %p480_p5 = pnand %p833_p7, %p714_p12 }
 0x25d   : > { %p481_p8 = pneg %p480_p5 }
 0x25f   : > { %607 = dma.done.wait (%p481_p8), %s394_s11, 512  }
 0x260   : > { %609 = vsyncadd (%p481_p8), %s394_s11, 4294966784  ;;  %p18_p10 = scmp.ge.s32.totalorder %s685_s24, 4   ;;  %s834_s18 = smov %s616_s19 }
 0x261   : > { %s835_s19 = smov %s620_s20  ;;  %s836_s20 = smov %s697_s27 }
 0x262   : > { %s837_s21 = smov %s685_s24  ;;  %20 = sbr.rel (!%p18_p10) target bundleno = 5 (0x5), region = 85 }
 0x267   :  { %400 = vsyncpa [#allocation3], 1 }
 0x268   :  { %402 = vsyncpa [#allocation3 + $0x1], 1 }
 0x269   :  { %403 = vsyncpa [#allocation4], 1 }
 0x26a   :  { %405 = vsyncpa [#allocation4 + $0x1], 1 }

</bundles_post_ra>
